<compile_context>
chip_gen: v6e
topology: v6e:2x2x1
jax: 0.10.0
libtpu: 0.0.40
codegen_flags: <defaults>
</compile_context>

<pallas_src>
import jax
import jax.numpy as jnp
from jax.experimental import pallas as pl
from jax.experimental.pallas import tpu as pltpu

# Deterministic "weights" from the module's __init__ (no checkpoint load).
ISOTROPIC = False
_W = 1.414214 if ISOTROPIC else 2.0
# sobel_kernel (Gx) and its transpose (Gy), exactly as in the PyTorch module.
KX = ((1.0, 0.0, -1.0),
      (_W, 0.0, -_W),
      (1.0, 0.0, -1.0))
KY = tuple(tuple(KX[j][i] for j in range(3)) for i in range(3))
GRAY_W = 1.0 / 3.0  # 1x1 grayscale conv weight (filled with 1/3)


def _choose_tile_h(H, W):
    """Largest multiple-of-8 divisor of H whose 3-channel f32 input tile is
    <= ~2 MiB (keeps double-buffered blocks well inside VMEM on all gens,
    including v7x's 64 MiB)."""
    if H % 8 != 0:
        return H  # whole-image fallback (block H-dim must be %8 or full)
    w_pad = ((W + 127) // 128) * 128  # lane padding in VMEM
    budget_rows = max(8, (2 * 1024 * 1024) // (3 * 4 * w_pad))
    best = 8
    cand = 8
    while cand <= H:
        if H % cand == 0 and cand <= budget_rows:
            best = cand
        cand += 8
    return best


def _make_sobel_kernel(th, hb, n_h):
    """Build the kernel for a TH-row output tile.

    x_ref   : (3, TH, W)  current row tile (all RGB channels)
    top_ref : (3, HB, W)  8-row block ending just above this tile (clamped at h=0)
    bot_ref : (3, HB, W)  8-row block starting just below this tile (clamped at last h)
    o_ref   : (2, TH, W)  [Gx, Gy]
    """

    def kernel(x_ref, top_ref, bot_ref, o_ref):
        x = x_ref[...].astype(jnp.float32)           # cast after DMA (bf16/u8 friendly)
        g = (x[0] + x[1] + x[2]) * GRAY_W            # grayscale, (TH, W)

        if n_h == 1:
            # Single tile: reflect padding at both image borders.
            top_row = g[1:2, :]                       # row -1 -> row 1
            bot_row = g[th - 2:th - 1, :]             # row H  -> row H-2
        else:
            hh = pl.program_id(1)
            xt = top_ref[:, hb - 1:hb, :].astype(jnp.float32)   # (3, 1, W)
            xb = bot_ref[:, 0:1, :].astype(jnp.float32)         # (3, 1, W)
            gt = (xt[0] + xt[1] + xt[2]) * GRAY_W               # row above the tile
            gb = (xb[0] + xb[1] + xb[2]) * GRAY_W               # row below the tile
            top_row = jnp.where(hh == 0, g[1:2, :], gt)                 # reflect @ top
            bot_row = jnp.where(hh == n_h - 1, g[th - 2:th - 1, :], gb)  # reflect @ bot

        # Vertically shifted neighbours (g_ext[i-1], g_ext[i+1]).
        up = jnp.concatenate([top_row, g[:th - 1, :]], axis=0)   # (TH, W)
        dn = jnp.concatenate([g[1:, :], bot_row], axis=0)        # (TH, W)

        # Separable Sobel: KX = [1,w,1]^T x [1,0,-1],  KY = KX^T.
        s = up + _W * g + dn          # vertical [1, w, 1]
        d = up - dn                   # vertical [1, 0, -1]

        w_ = g.shape[1]
        # Reflect padding in W (column -1 -> 1, column W -> W-2).
        s_ext = jnp.concatenate([s[:, 1:2], s, s[:, w_ - 2:w_ - 1]], axis=1)  # (TH, W+2)
        d_ext = jnp.concatenate([d[:, 1:2], d, d[:, w_ - 2:w_ - 1]], axis=1)

        gx = s_ext[:, 0:w_] - s_ext[:, 2:w_ + 2]
        gy = d_ext[:, 0:w_] + _W * d_ext[:, 1:w_ + 1] + d_ext[:, 2:w_ + 2]

        o_ref[0, :, :] = gx.astype(o_ref.dtype)
        o_ref[1, :, :] = gy.astype(o_ref.dtype)

    return kernel


def sobel_forward(x, *, tile_h=None):
    """x: (N, 3, H, W) NCHW (any float/int dtype) -> (N, 2, H, W) float32."""
    N, C, H, W = x.shape
    assert C == 3, "grayscale conv expects 3 input channels"
    assert H >= 2 and W >= 2, "reflect padding (pad=1) needs H, W >= 2"

    TH = tile_h if tile_h is not None else _choose_tile_h(H, W)
    if H % TH != 0 or (TH % 8 != 0 and TH != H):
        TH = H                      # keep block shapes legal
    n_h = H // TH
    HB = 8 if H >= 8 else H         # halo block rows (sublane aligned)
    nb = TH // HB                   # halo blocks per output tile
    max_blk = pl.cdiv(H, HB) - 1    # last halo block index (clamp target)

    # Rough VMEM estimate (double-buffered blocks + in-kernel temporaries);
    # only raise the scoped limit if we actually exceed the conservative default.
    w_pad = ((W + 127) // 128) * 128
    need = (2 * (3 * TH + 2 * TH + 2 * 3 * HB) + 12 * TH) * w_pad * 4
    params = dict(dimension_semantics=("parallel", "parallel"))
    if need > 16 * 1024 * 1024:
        params["vmem_limit_bytes"] = min(int(need), 48 * 1024 * 1024)

    kernel = _make_sobel_kernel(TH, HB, n_h)

    # NOTE: W is kept as the lane axis; for typical image widths (>=128) the
    # output stores are lane-dense.  Flattening H*W onto the lane axis for
    # tiny W would require an in-kernel relayout that costs more than the
    # masked stores it removes on this HBM-bound op.
    return pl.pallas_call(
        kernel,
        out_shape=jax.ShapeDtypeStruct((N, 2, H, W), jnp.float32),
        grid=(N, n_h),
        in_specs=[
            # current row tile
            pl.BlockSpec((None, 3, TH, W), lambda b, hh: (b, 0, hh, 0)),
            # 8-row block just above the tile (clamped to block 0 at the top)
            pl.BlockSpec((None, 3, HB, W),
                         lambda b, hh: (b, 0, jnp.maximum(hh * nb - 1, 0), 0)),
            # 8-row block just below the tile (clamped to the last block)
            pl.BlockSpec((None, 3, HB, W),
                         lambda b, hh: (b, 0, jnp.minimum((hh + 1) * nb, max_blk), 0)),
        ],
        out_specs=pl.BlockSpec((None, 2, TH, W), lambda b, hh: (b, 0, hh, 0)),
        compiler_params=pltpu.CompilerParams(**params),
    )(x, x, x)


def _sobel_reference(x):
    """Pure-JAX reference (direct 12-tap form) for verification."""
    x = x.astype(jnp.float32)
    gray = jnp.mean(x, axis=1)  # (N, H, W)
    gp = jnp.pad(gray, ((0, 0), (1, 1), (1, 1)), mode="reflect")
    N, H, W = gray.shape
    gx = jnp.zeros((N, H, W), jnp.float32)
    gy = jnp.zeros((N, H, W), jnp.float32)
    for di in range(3):
        for dj in range(3):
            patch = gp[:, di:di + H, dj:dj + W]
            gx = gx + KX[di][dj] * patch
            gy = gy + KY[di][dj] * patch
    return jnp.stack([gx, gy], axis=1)


if __name__ == "__main__":
    key = jax.random.PRNGKey(0)
    k1, k2 = jax.random.split(key)

    # Single-tile case (module defaults: RGB input).
    x1 = jax.random.normal(k1, (2, 3, 16, 16), dtype=jnp.float32)
    out1 = jax.block_until_ready(sobel_forward(x1))
    ref1 = _sobel_reference(x1)
    assert out1.shape == (2, 2, 16, 16)
    assert jnp.allclose(out1, ref1, atol=1e-4, rtol=1e-4), "mismatch (single tile)"

    # Multi-tile case: 4 row tiles, exercises the halo + in-kernel reflect path.
    x2 = jax.random.normal(k2, (2, 3, 32, 48), dtype=jnp.float32)
    out2 = jax.block_until_ready(sobel_forward(x2, tile_h=8))
    ref2 = _sobel_reference(x2)
    assert out2.shape == (2, 2, 32, 48)
    assert jnp.allclose(out2, ref2, atol=1e-4, rtol=1e-4), "mismatch (row tiles)"

    print("KERNEL_OK")
</pallas_src>

<mosaic_0001>
module attributes {stable_mosaic.version = 11 : i64} {
  func.func @kernel(%arg0: i32, %arg1: i32, %arg2: memref<1x3x16x16xf32, #tpu.memory_space<vmem>>, %arg3: memref<1x3x8x16xf32, #tpu.memory_space<vmem>>, %arg4: memref<1x3x8x16xf32, #tpu.memory_space<vmem>>, %arg5: memref<1x2x16x16xf32, #tpu.memory_space<vmem>>) attributes {dimension_semantics = [#tpu.dimension_semantics<parallel>, #tpu.dimension_semantics<parallel>], iteration_bounds = array<i64: 2, 1>, scalar_prefetch = 0 : i64, scratch_operands = 0 : i64, tpu.core_type = #tpu.core_type<tc>, window_params = [{transform_indices = @transform_0, window_bounds = array<i64: 1, 3, 16, 16>}, {transform_indices = @transform_1, window_bounds = array<i64: 1, 3, 8, 16>}, {transform_indices = @transform_2, window_bounds = array<i64: 1, 3, 8, 16>}, {transform_indices = @transform_3, window_bounds = array<i64: 1, 2, 16, 16>}]} {
    %c0 = arith.constant 0 : index
    %c0_0 = arith.constant 0 : index
    %c0_1 = arith.constant 0 : index
    %c0_2 = arith.constant 0 : index
    %0 = vector.load %arg2[%c0, %c0_0, %c0_1, %c0_2] : memref<1x3x16x16xf32, #tpu.memory_space<vmem>>, vector<1x3x16x16xf32>
    %1 = vector.shape_cast %0 : vector<1x3x16x16xf32> to vector<3x16x16xf32>
    %2 = vector.extract_strided_slice %1 {offsets = [0, 0, 0], sizes = [1, 16, 16], strides = [1, 1, 1]} : vector<3x16x16xf32> to vector<1x16x16xf32>
    %3 = vector.shape_cast %2 : vector<1x16x16xf32> to vector<16x16xf32>
    %4 = vector.extract_strided_slice %1 {offsets = [1, 0, 0], sizes = [1, 16, 16], strides = [1, 1, 1]} : vector<3x16x16xf32> to vector<1x16x16xf32>
    %5 = vector.shape_cast %4 : vector<1x16x16xf32> to vector<16x16xf32>
    %6 = arith.addf %3, %5 : vector<16x16xf32>
    %7 = vector.extract_strided_slice %1 {offsets = [2, 0, 0], sizes = [1, 16, 16], strides = [1, 1, 1]} : vector<3x16x16xf32> to vector<1x16x16xf32>
    %8 = vector.shape_cast %7 : vector<1x16x16xf32> to vector<16x16xf32>
    %9 = arith.addf %6, %8 : vector<16x16xf32>
    %cst = arith.constant 0.333333343 : f32
    %10 = vector.broadcast %cst : f32 to vector<16x16xf32>
    %11 = arith.mulf %9, %10 : vector<16x16xf32>
    %12 = vector.extract_strided_slice %11 {offsets = [1, 0], sizes = [1, 16], strides = [1, 1]} : vector<16x16xf32> to vector<1x16xf32>
    %13 = vector.extract_strided_slice %11 {offsets = [14, 0], sizes = [1, 16], strides = [1, 1]} : vector<16x16xf32> to vector<1x16xf32>
    %14 = vector.extract_strided_slice %11 {offsets = [0, 0], sizes = [15, 16], strides = [1, 1]} : vector<16x16xf32> to vector<15x16xf32>
    %15 = tpu.concatenate %12, %14 in 0 : vector<1x16xf32>, vector<15x16xf32> -> vector<16x16xf32>
    %16 = vector.extract_strided_slice %11 {offsets = [1, 0], sizes = [15, 16], strides = [1, 1]} : vector<16x16xf32> to vector<15x16xf32>
    %17 = tpu.concatenate %16, %13 in 0 : vector<15x16xf32>, vector<1x16xf32> -> vector<16x16xf32>
    %cst_3 = arith.constant 2.000000e+00 : f32
    %18 = vector.broadcast %cst_3 : f32 to vector<16x16xf32>
    %19 = arith.mulf %18, %11 : vector<16x16xf32>
    %20 = arith.addf %15, %19 : vector<16x16xf32>
    %21 = arith.addf %20, %17 : vector<16x16xf32>
    %22 = arith.subf %15, %17 : vector<16x16xf32>
    %23 = vector.extract_strided_slice %21 {offsets = [0, 1], sizes = [16, 1], strides = [1, 1]} : vector<16x16xf32> to vector<16x1xf32>
    %24 = vector.extract_strided_slice %21 {offsets = [0, 14], sizes = [16, 1], strides = [1, 1]} : vector<16x16xf32> to vector<16x1xf32>
    %25 = tpu.concatenate %23, %21, %24 in 1 : vector<16x1xf32>, vector<16x16xf32>, vector<16x1xf32> -> vector<16x18xf32>
    %26 = vector.extract_strided_slice %22 {offsets = [0, 1], sizes = [16, 1], strides = [1, 1]} : vector<16x16xf32> to vector<16x1xf32>
    %27 = vector.extract_strided_slice %22 {offsets = [0, 14], sizes = [16, 1], strides = [1, 1]} : vector<16x16xf32> to vector<16x1xf32>
    %28 = tpu.concatenate %26, %22, %27 in 1 : vector<16x1xf32>, vector<16x16xf32>, vector<16x1xf32> -> vector<16x18xf32>
    %29 = vector.extract_strided_slice %25 {offsets = [0, 0], sizes = [16, 16], strides = [1, 1]} : vector<16x18xf32> to vector<16x16xf32>
    %30 = vector.extract_strided_slice %25 {offsets = [0, 2], sizes = [16, 16], strides = [1, 1]} : vector<16x18xf32> to vector<16x16xf32>
    %31 = arith.subf %29, %30 : vector<16x16xf32>
    %32 = vector.extract_strided_slice %28 {offsets = [0, 0], sizes = [16, 16], strides = [1, 1]} : vector<16x18xf32> to vector<16x16xf32>
    %33 = vector.extract_strided_slice %28 {offsets = [0, 1], sizes = [16, 16], strides = [1, 1]} : vector<16x18xf32> to vector<16x16xf32>
    %cst_4 = arith.constant 2.000000e+00 : f32
    %34 = vector.broadcast %cst_4 : f32 to vector<16x16xf32>
    %35 = arith.mulf %34, %33 : vector<16x16xf32>
    %36 = arith.addf %32, %35 : vector<16x16xf32>
    %37 = vector.extract_strided_slice %28 {offsets = [0, 2], sizes = [16, 16], strides = [1, 1]} : vector<16x18xf32> to vector<16x16xf32>
    %38 = arith.addf %36, %37 : vector<16x16xf32>
    %c0_5 = arith.constant 0 : index
    %c0_6 = arith.constant 0 : index
    %c0_7 = arith.constant 0 : index
    %c0_8 = arith.constant 0 : index
    %39 = vector.load %arg5[%c0_5, %c0_6, %c0_7, %c0_8] : memref<1x2x16x16xf32, #tpu.memory_space<vmem>>, vector<1x1x16x16xf32>
    %40 = vector.shape_cast %39 : vector<1x1x16x16xf32> to vector<16x16xf32>
    %41 = vector.shape_cast %31 : vector<16x16xf32> to vector<1x1x16x16xf32>
    tpu.vector_store %arg5[%c0_5, %c0_6, %c0_7, %c0_8], %41 {strides = array<i32>} : memref<1x2x16x16xf32, #tpu.memory_space<vmem>>, vector<1x1x16x16xf32>,
    %c0_9 = arith.constant 0 : index
    %c1 = arith.constant 1 : index
    %c0_10 = arith.constant 0 : index
    %c0_11 = arith.constant 0 : index
    %42 = vector.load %arg5[%c0_9, %c1, %c0_10, %c0_11] : memref<1x2x16x16xf32, #tpu.memory_space<vmem>>, vector<1x1x16x16xf32>
    %43 = vector.shape_cast %42 : vector<1x1x16x16xf32> to vector<16x16xf32>
    %44 = vector.shape_cast %38 : vector<16x16xf32> to vector<1x1x16x16xf32>
    tpu.vector_store %arg5[%c0_9, %c1, %c0_10, %c0_11], %44 {strides = array<i32>} : memref<1x2x16x16xf32, #tpu.memory_space<vmem>>, vector<1x1x16x16xf32>,
    return
  }
  func.func @transform_0(%arg0: i32, %arg1: i32) -> (i32, i32, i32, i32) {
    %c0_i32 = arith.constant 0 : i32
    %c0_i32_0 = arith.constant 0 : i32
    %c0_i32_1 = arith.constant 0 : i32
    return %arg0, %c0_i32, %arg1, %c0_i32_0 : i32, i32, i32, i32
  }
  func.func @transform_1(%arg0: i32, %arg1: i32) -> (i32, i32, i32, i32) {
    %c2_i32 = arith.constant 2 : i32
    %0 = arith.muli %arg1, %c2_i32 : i32
    %c1_i32 = arith.constant 1 : i32
    %1 = arith.subi %0, %c1_i32 : i32
    %c0_i32 = arith.constant 0 : i32
    %2 = arith.maxsi %1, %c0_i32 : i32
    %c0_i32_0 = arith.constant 0 : i32
    %c0_i32_1 = arith.constant 0 : i32
    %c0_i32_2 = arith.constant 0 : i32
    return %arg0, %c0_i32_0, %2, %c0_i32_1 : i32, i32, i32, i32
  }
  func.func @transform_2(%arg0: i32, %arg1: i32) -> (i32, i32, i32, i32) {
    %c1_i32 = arith.constant 1 : i32
    %0 = arith.addi %arg1, %c1_i32 : i32
    %c2_i32 = arith.constant 2 : i32
    %1 = arith.muli %0, %c2_i32 : i32
    %c1_i32_0 = arith.constant 1 : i32
    %2 = arith.minsi %1, %c1_i32_0 : i32
    %c0_i32 = arith.constant 0 : i32
    %c0_i32_1 = arith.constant 0 : i32
    %c0_i32_2 = arith.constant 0 : i32
    return %arg0, %c0_i32, %2, %c0_i32_1 : i32, i32, i32, i32
  }
  func.func @transform_3(%arg0: i32, %arg1: i32) -> (i32, i32, i32, i32) {
    %c0_i32 = arith.constant 0 : i32
    %c0_i32_0 = arith.constant 0 : i32
    %c0_i32_1 = arith.constant 0 : i32
    return %arg0, %c0_i32, %arg1, %c0_i32_0 : i32, i32, i32, i32
  }
}

</mosaic_0001>

<bundles_post_ra>
// kernel: tpu_custom_call.1
= control target key start
LH: loop header
LB: loop body
LE: loop exit
PB: predicated region body
PF: predicated region fallthrough
CT: control target
= control target key end

     0   :  { %s1145_s0 = inlined_call_operand.hbm [shape: f32[2,3,16,16], index: 0, kind: input, shape index: {}]   ;;  %s1146_s1 = inlined_call_operand.hbm [shape: f32[2,3,16,16], index: 1, kind: input, shape index: {}]   ;;  %s1147_s2 = inlined_call_operand.hbm [shape: f32[2,3,16,16], index: 2, kind: input, shape index: {}]   ;;  %s1148_s3 = inlined_call_operand.hbm [shape: f32[2,2,16,16], index: 3, kind: output, shape index: {}]  }
   0x1   :  { %1158 = sst [smem:[#allocation16_spill]] %s1146_s1 }
   0x2   :  { %8 = vsyncpa [#allocation3], 0 }
   0x3   :  { %10 = vsyncpa [#allocation3 + $0x1], 0 }
   0x4   :  { %11 = vsyncpa [#allocation6], 0 }
   0x5   :  { %13 = vsyncpa [#allocation6 + $0x1], 0 }
   0x6   :  { %14 = vsyncpa [#allocation4], 0 }
   0x7   :  { %16 = vsyncpa [#allocation4 + $0x1], 0  ;;  %s911_s12 = smov 0   ;;  %s913_s13 = smov 0  }
   0x8   :  { %s915_s14 = smov 0   ;;  %s917_s15 = smov 0  }
   0x9   :  { %s919_s16 = smov 0   ;;  %s921_s17 = smov 0  }
   0xa LB: > { %1159 = sst [smem:[#allocation12_spill]] %s864_s14  ;;  %s942_s18 = sadd.s32 4294967295, %s876_s17   ;;  %s876_s17 = sphi %s921_s17, %s22_s17   ;;  %s872_s16 = sphi %s919_s16, %s1178_s16   ;;  %s868_s15 = sphi %s917_s15, %s1177_s15   ;;  %s864_s14 = sphi %s915_s14, %s1176_s14   ;;  %s860_s13 = sphi %s913_s13, %s1180_s13   ;;  %s856_s12 = sphi %s911_s12, %s1179_s12  }
   0xb   : > { %1160 = sst [smem:[#allocation13_spill]] %s872_s16  ;;  %s601_s19 = sadd.s32 4294967294, %s876_s17  }
   0xc   : > { %s34_s20 = sadd.s32 1, %s872_s16  ;;  %s43_s21 = sadd.s32 1, %s864_s14 }
   0xd   : > { %p36_p0 = scmp.ge.s32.totalorder %s34_s20, 2  ;;  %p50_p1 = scmp.ne.s32.totalorder %s864_s14, %s860_s13 }
   0xe   : > { %p51_p2 = scmp.eq.s32.totalorder %s876_s17, 0  ;;  %p56_p3 = scmp.ne.s32.totalorder %s860_s13, %s856_s12 }
   0xf   : > { %s1182_s20 = smov (%p36_p0, %s34_s20), 0  ;;  %p57_p5 = scmp.eq.s32.totalorder %s942_s18, 0 }
  0x10   : > { %1161 = sst [smem:[#allocation14_spill]] %s1182_s20  ;;  %p954_p4 = por %p51_p2, %p50_p1 }
  0x11   : > { %s38_s23 = ssub.s32 %s872_s16, %s1182_s20  ;;  %p154_p6 = scmp.eq.s32.totalorder %s942_s18, 1 }
  0x12   : > { %p41_p7 = scmp.eq.s32.totalorder %s38_s23, 0  ;;  %p962_p8 = por %p57_p5, %p56_p3 }
  0x13   : > { %p966_p9 = por %p154_p6, %p50_p1  ;;  %p160_p10 = scmp.eq.s32.totalorder %s601_s19, 1 }
  0x14   : > { %s971_s26 = scalar_select %p41_p7, %s864_s14, %s43_s21  }
  0x15   : > { %p973_p11 = por %p160_p10, %p56_p3  ;;  %p648_p13 = scmp.lt.s32.totalorder %s876_s17, 2 }
  0x16   : > { %1165 = sst [smem:[#allocation15_spill]] %s971_s26  ;;  %s980_s28 = sand.u32 1, %s864_s14  }
  0x17   : > { %s983_s29 = smul.u32 768, %s872_s16  ;;  %p987_p0 = pnand %p648_p13, %p954_p4 }
  0x18   : > { %s203_s4 = sand.u32 1, %s876_s17   ;;  %s1149_s5 = smul.u32 24, %s980_s28 }
  0x19   : > { %s1168_s1 = sld [smem:[#allocation16_spill]]  ;;  %s999_s11 = scalar_lea.sflag [#allocation6], %s203_s4 }
  0x1a   : > { %s207_s9 = scalar_lea.vmem [#allocation5], %s1149_s5  ;;  %p710_p1 = pneg %p987_p0 }
  0x1b   : > { %s219_s10 = sshll.u32 %s207_s9, 4  ;;  %s878_s21 = smov [#allocation5]   ;;  %s220_s10 = int_to_ptr.vmem [resolvable:$true] %s219_s10 }
  0x1c   : > { %s721_s19 = scalar_lea.vmem %s220_s10, 384  ;;  %s726_s22 = sshll.u32 %s878_s21, 4  ;;  %s727_s22 = int_to_ptr.vmem [resolvable:$false] %s726_s22 }
  0x1d   : > { %p722_p2 = scmp.ne.s32.totalorder %s220_s10, %s721_s19  ;;  %s728_s23 = scalar_lea.vmem %s727_s22, 768 }
  0x1e   : > { %p729_p5 = scmp.lt.s32.totalorder %s220_s10, %s727_s22  ;;  %p730_p6 = scmp.lt.s32.totalorder %s728_s23, %s721_s19 }
  0x1f   : > { %s218_s8 = scalar_lea.hbm %s1168_s1, %s983_s29  ;;  %p724_p3 = pnand %p722_p2, %p710_p1 }
  0x20   : > { %p731_p7 = por %p730_p6, %p729_p5 }
  0x21   : > { %p725_p4 = pneg %p724_p3 }
  0x23   : > { %p732_p10 = pnand %p731_p7, %p725_p4 }
  0x25   : > { %735 = shalt.err (!%p732_p10)
}
  0x26   : > { %s1152_s6 = smov 256   ;;  %s1153_s4 = smov 128  }
  0x27   : > { %s1155_s7 = smov 8   ;;  %p607_p13 = scmp.ge.s32.totalorder %s876_s17, 1 }
  0x28   : > { %640 = dma.hbm_to_vmem [thread:$0]  (!%p987_p0), %s218_s8, 384, %s220_s10, %s999_s11, %s1152_s6, %s1153_s4, %s1155_s7  }
  0x29   : > { %p253_p2 = scmp.lt.s32.totalorder %s876_s17, 3  ;;  %s619_s19 = smul.u32 48, %s980_s28 }
  0x2a   : > { %s192_s23 = scalar_lea.hbm %s1145_s0, %s983_s29  ;;  %s617_s5 = sadd.s32 128, %s983_s29 }
  0x2b   : > { %p1014_p3 = pnand %p607_p13, %p253_p2  ;;  %s1027_s16 = scalar_lea.hbm %s1147_s2, %s617_s5 }
  0x2c   : > { %s184_s26 = scalar_lea.vmem [#allocation2], %s619_s19  ;;  %s1170_s10 = smul.u32 24, %s980_s28 }
  0x2d   : > { %s193_s8 = sshll.u32 %s184_s26, 4  ;;  %s181_s7 = scalar_lea.sflag [#allocation3], %s980_s28  ;;  %s194_s8 = int_to_ptr.vmem [resolvable:$true] %s193_s8 }
  0x2e   : > { %s233_s6 = scalar_lea.vmem [#allocation7], %s1170_s10  ;;  %s749_s14 = scalar_lea.vmem %s194_s8, 768 }
  0x2f   : > { %s245_s4 = sshll.u32 %s233_s6, 4  ;;  %p750_p4 = scmp.ne.s32.totalorder %s194_s8, %s749_s14  ;;  %s1031_s4 = int_to_ptr.vmem [resolvable:$true] %s245_s4 }
  0x30   : > { %s882_s29 = smov [#allocation2]  }
  0x31   : > { %p752_p5 = pnand %p750_p4, %p710_p1  ;;  %s754_s21 = sshll.u32 %s882_s29, 4  ;;  %s755_s21 = int_to_ptr.vmem [resolvable:$false] %s754_s21 }
  0x32   : > { %s756_s1 = scalar_lea.vmem %s755_s21, 1536  ;;  %p757_p7 = scmp.lt.s32.totalorder %s194_s8, %s755_s21 }
  0x33   : > { %p753_p6 = pneg %p752_p5  ;;  %p758_p10 = scmp.lt.s32.totalorder %s756_s1, %s749_s14 }
  0x35   : > { %p759_p13 = por %p758_p10, %p757_p7 }
  0x37   : > { %p760_p2 = pnand %p759_p13, %p753_p6 }
  0x39   : > { %763 = shalt.err (!%p760_p2)
}
  0x3a   : > { %s1171_s20 = smov 8   ;;  %s1172_s26 = smov 128  }
  0x3b   : > { %637 = dma.hbm_to_vmem [thread:$0]  (!%p987_p0), %s192_s23, 768, %s194_s8, %s181_s7, %s1172_s26, %s1172_s26, %s1171_s20  }
  0x3c   : > { %s777_s28 = scalar_lea.vmem %s1031_s4, 384  ;;  %s883_s14 = smov [#allocation7]  }
  0x3d   : > { %p778_p4 = scmp.ne.s32.totalorder %s1031_s4, %s777_s28  ;;  %s782_s5 = sshll.u32 %s883_s14, 4  ;;  %s783_s5 = int_to_ptr.vmem [resolvable:$false] %s782_s5 }
  0x3e   : > { %s784_s6 = scalar_lea.vmem %s783_s5, 768  ;;  %p785_p6 = scmp.lt.s32.totalorder %s1031_s4, %s783_s5 }
  0x3f   : > { %p780_p5 = pnand %p778_p4, %p710_p1  ;;  %p786_p7 = scmp.lt.s32.totalorder %s784_s6, %s777_s28 }
  0x41   : > { %p781_p12 = pneg %p780_p5  ;;  %p787_p10 = por %p786_p7, %p785_p6 }
  0x43   : > { %p788_p13 = pnand %p787_p10, %p781_p12 }
  0x45   : > { %791 = shalt.err (!%p788_p13)
}
  0x46   : > { %s1173_s7 = smov 256   ;;  %257 = sbr.rel (%p1014_p3) target bundleno = 364 (0x16c), region = 32 }
  0x47   : > { %643 = dma.hbm_to_vmem [thread:$0]  (!%p987_p0), %s1027_s16, 384, %s1031_s4, %s999_s11, %s1173_s7, %s1172_s26, %s1171_s20  }
  0x48   : > { %s1059_s19 = sand.u32 (!%p1014_p3), 1, %s860_s13  }
  0x49   : > { %s625_s22 = smul.u32 (!%p1014_p3), 48, %s1059_s19  ;;  %s260_s23 = scalar_lea.sflag (!%p1014_p3), [#allocation3], %s1059_s19 }
  0x4b   : > { %s263_s8 = scalar_lea.vmem [#allocation2], %s625_s22 }
  0x4c   : > { %843 = dma.done.wait (%p962_p8), %s260_s23, 768  }
  0x4d   : > { %845 = vsyncadd (%p962_p8), %s260_s23, 4294966528  ;;  %s268_s16 = sand.u32 1, %s942_s18  }
  0x4e   : > { %s269_s30 = scalar_lea.sflag [#allocation6], %s268_s16 }
  0x4f   : > { %847 = dma.done.wait (%p962_p8), %s269_s30, 768  }
  0x50   : > { %849 = vsyncadd (%p962_p8), %s269_s30, 4294966528  ;;  %v324_v0 = vld [vmem:[%s263_s8] sm:$0xff]  ;;  %v325_v1 = vld [vmem:[%s263_s8 + $0x8] sm:$0xff]  ;;  %vm340_vm0 = vcmask 1040384   ;;  %vm347_vm1 = vcmask 1046528   ;;  %s884_s18 = smov 1  }
  0x51   : > { %v326_v2 = vld [vmem:[%s263_s8 + $0x10] sm:$0xff]  ;;  %v327_v3 = vld [vmem:[%s263_s8 + $0x18] sm:$0xff]  ;;  %v328_v4 = vld [vmem:[%s263_s8 + $0x20] sm:$0xff]  ;;  %s885_s24 = smov 127   ;;  %s886_s11 = smov 3   ;;  %vm382_vm2 = vcmask 7168  }
  0x52   : > { %v329_v5 = vld [vmem:[%s263_s8 + $0x28] sm:$0xff]  ;;  %v330_v6 = vadd.f32 %v326_v2, %v324_v0  ;;  %v331_v7 = vadd.f32 %v327_v3, %v325_v1  ;;  %vm385_vm3 = vcmask 138240   ;;  %s887_s4 = smov 126   ;;  %s608_s9 = sshll.u32 %s1059_s19, 5  ;;  %vm444_vm4 = vcmask 130048  }
  0x53   : > { %s313_s10 = scalar_lea.vmem [#allocation8], %s608_s9  ;;  %s618_s21 = sshll.u32 %s868_s15, 9 }
  0x54   : > { %v332_v8 = vadd.f32 %v330_v6, %v328_v4  ;;  %v333_v9 = vadd.f32 %v331_v7, %v329_v5  ;;  %s466_s29 = sshll.u32 %s313_s10, 4  ;;  %s1095_s26 = scalar_lea.hbm %s1148_s3, %s618_s21  ;;  %s1088_s29 = int_to_ptr.vmem [resolvable:$true] %s466_s29 }
  0x55   : > { %s451_s15 = scalar_lea.sflag [#allocation4], %s1059_s19  ;;  %s792_s28 = scalar_lea.vmem %s1088_s29, 512 }
  0x56   : > { %v334_v10 = vmul.f32 0.33333334, %v332_v8  ;;  %v335_v11 = vmul.f32 0.33333334, %v333_v9  ;;  %p793_p8 = scmp.ne.s32.totalorder %s1088_s29, %s792_s28  ;;  %s888_s14 = smov [#allocation8]  }
  0x57   : > { %s796_s5 = sshll.u32 %s888_s14, 4  ;;  %s797_s5 = int_to_ptr.vmem [resolvable:$false] %s796_s5 }
  0x58   : > { %v337_v12 = vrot.slane %v334_v10, 1  ;;  %v341_v13 = vrot.slane %v334_v10, 7  ;;  %v348_v14 = vrot.slane %v335_v11, 1  ;;  %v342_v15 = vrot.slane %v335_v11, 7  ;;  %p794_p12 = pnand %p793_p8, %p966_p9  ;;  %s798_s6 = scalar_lea.vmem %s797_s5, 1024 }
  0x59   : > { %v355_v22 = vmul.f32 2.0, %v335_v11  ;;  %v354_v23 = vmul.f32 2.0, %v334_v10  ;;  %p799_p1 = scmp.lt.s32.totalorder %s1088_s29, %s797_s5  ;;  %p800_p3 = scmp.lt.s32.totalorder %s798_s6, %s792_s28 }
  0x5a   : > { %v346_v16 = vsel %vm340_vm0, %v337_v12, %v341_v13  ;;  %v349_v17 = vsel %vm347_vm1, %v337_v12, %v348_v14  ;;  %v343_v18 = vsel %vm340_vm0, %v341_v13, %v342_v15  ;;  %v353_v19 = vsel %vm347_vm1, %v348_v14, %v342_v15  ;;  %p795_p0 = pneg %p794_p12 }
  0x5b   : > { %v360_v20 = vsub.f32 %v346_v16, %v349_v17  ;;  %v361_v21 = vsub.f32 %v343_v18, %v353_v19  ;;  %v357_v24 = vadd.f32 %v355_v22, %v343_v18  ;;  %v356_v25 = vadd.f32 %v354_v23, %v346_v16  ;;  %p801_p2 = por %p800_p3, %p799_p1 }
  0x5d   : > { %396 = vrot.lane.b32.xlu1 %v360_v20, %s884_s18  ;;  %390 = vrot.lane.b32.xlu0 %v360_v20, %s885_s24  ;;  %v359_v26 = vadd.f32 %v357_v24, %v353_v19  ;;  %v358_v27 = vadd.f32 %v356_v25, %v349_v17  ;;  %p802_p4 = pnand %p801_p2, %p795_p0 }
  0x61   : > { %398 = vrot.lane.b32.xlu1 %v361_v21, %s884_s18  ;;  %392 = vrot.lane.b32.xlu0 %v361_v21, %s885_s24 }
  0x65   : > { %404 = vrot.lane.b32.xlu1 %v361_v21, %s886_s11  ;;  %402 = vrot.lane.b32.xlu0 %v360_v20, %s886_s11 }
  0x69   : > { %366 = vrot.lane.b32.xlu1 %v359_v26, %s885_s24  ;;  %364 = vrot.lane.b32.xlu0 %v358_v27, %s885_s24 }
  0x6d   : > { %372 = vrot.lane.b32.xlu1 %v359_v26, %s884_s18  ;;  %370 = vrot.lane.b32.xlu0 %v358_v27, %s884_s18 }
  0x71   : > { %378 = vrot.lane.b32.xlu1 %v359_v26, %s886_s11  ;;  %376 = vrot.lane.b32.xlu0 %v358_v27, %s886_s11 }
  0xcf   : > { %v397_v28 = vpop.permute.xlu1 %396  ;;  %v391_v29 = vpop.permute.xlu0 %390 }
  0xd0   : > { %v408_v32 = vsel %vm382_vm2, %v391_v29, %v397_v28 }
  0xd3   : > { %v399_v30 = vpop.permute.xlu1 %398  ;;  %v393_v31 = vpop.permute.xlu0 %392 }
  0xd4   : > { %v409_v33 = vsel %vm382_vm2, %v393_v31, %v399_v30 }
  0xd7   : > { %v405_v34 = vpop.permute.xlu1 %404  ;;  %v403_v35 = vpop.permute.xlu0 %402 }
  0xd8   : > { %v411_v36 = vsel %vm385_vm3, %v409_v33, %v405_v34  ;;  %v410_v37 = vsel %vm385_vm3, %v408_v32, %v403_v35 }
  0xd9   : > { %v423_v38 = vmul.f32 2.0, %v411_v36  ;;  %v422_v39 = vmul.f32 2.0, %v410_v37 }
  0xdb   : > { %v367_v40 = vpop.permute.xlu1 %366  ;;  %428 = vrot.lane.b32.xlu1 %v423_v38, %s885_s24  ;;  %426 = vrot.lane.b32.xlu0 %v422_v39, %s885_s24  ;;  %v365_v41 = vpop.permute.xlu0 %364 }
  0xdf   : > { %v373_v42 = vpop.permute.xlu1 %372  ;;  %v371_v43 = vpop.permute.xlu0 %370 }
  0xe0   : > { %v384_v44 = vsel %vm382_vm2, %v367_v40, %v373_v42  ;;  %v383_v45 = vsel %vm382_vm2, %v365_v41, %v371_v43 }
  0xe3   : > { %v379_v46 = vpop.permute.xlu1 %378  ;;  %v377_v47 = vpop.permute.xlu0 %376 }
  0xe4   : > { %v387_v48 = vsel %vm385_vm3, %v384_v44, %v379_v46  ;;  %v386_v49 = vsel %vm385_vm3, %v383_v45, %v377_v47 }
  0xe5   : > { %416 = vrot.lane.b32.xlu1 %v387_v48, %s887_s4  ;;  %414 = vrot.lane.b32.xlu0 %v386_v49, %s887_s4 }
  0xe9   : > { %438 = vrot.lane.b32.xlu1 %v411_v36, %s887_s4  ;;  %436 = vrot.lane.b32.xlu0 %v410_v37, %s887_s4 }
 0x14d   : > { %v429_v50 = vpop.permute.xlu1 %428  ;;  %v427_v51 = vpop.permute.xlu0 %426 }
 0x14e   : > { %v433_v56 = vadd.f32 %v429_v50, %v411_v36  ;;  %v432_v57 = vadd.f32 %v427_v51, %v410_v37 }
 0x157   : > { %v417_v52 = vpop.permute.xlu1 %416  ;;  %v415_v53 = vpop.permute.xlu0 %414 }
 0x158   : > { %v421_v54 = vsub.f32 %v387_v48, %v417_v52  ;;  %v420_v55 = vsub.f32 %v386_v49, %v415_v53 }
 0x15a   : > { %446 = vst.msk [vmem:[%s313_s10 + $0x8] sm:$0xff] %vm444_vm4, %v421_v54  ;;  %445 = vst.msk [vmem:[%s313_s10] sm:$0xff] %vm444_vm4, %v420_v55 }
 0x15b   : > { %v439_v58 = vpop.permute.xlu1 %438  ;;  %v437_v59 = vpop.permute.xlu0 %436 }
 0x15c   : > { %v443_v60 = vadd.f32 %v439_v58, %v433_v56  ;;  %v442_v61 = vadd.f32 %v437_v59, %v432_v57 }
 0x15e   : > { %610 = vst.msk [vmem:[%s313_s10 + $0x18] sm:$0xff] %vm444_vm4, %v443_v60  ;;  %609 = vst.msk [vmem:[%s313_s10 + $0x10] sm:$0xff] %vm444_vm4, %v442_v61 }
 0x15f   : > { %805 = shalt.err (!%p802_p4)
}
 0x160   : > { %s806_s7 = scalar_lea.hbm %s1095_s26, 512  ;;  %s810_s8 = scalar_lea.hbm %s1148_s3, 1024 }
 0x161   : > { %p807_p5 = scmp.ne.s32.totalorder %s1095_s26, %s806_s7  ;;  %p811_p10 = scmp.lt.s32.totalorder %s1095_s26, %s1148_s3 }
 0x162   : > { %p812_p13 = scmp.lt.s32.totalorder %s810_s8, %s806_s7 }
 0x163   : > { %p808_p6 = pnand %p807_p5, %p966_p9 }
 0x164   : > { %p813_p8 = por %p812_p13, %p811_p10 }
 0x165   : > { %p809_p7 = pneg %p808_p6 }
 0x167   : > { %p814_p12 = pnand %p813_p8, %p809_p7 }
 0x169   : > { %817 = shalt.err (!%p814_p12)
}
 0x16a   : > { %s889_s18 = smov 128   ;;  %s890_s24 = smov 8  }
 0x16b   : > { %632 = dma.vmem_to_hbm [thread:$0]  (%p966_p9), %s1088_s29, 512, %s1095_s26, %s451_s15, %s889_s18, %s889_s18, %s890_s24  }
 0x16c PF: > { %s481_s11 = sand.u32 1, %s856_s12   ;;  %p1174_p0 = scmp.ge.s32.totalorder %s876_s17, 2 }
 0x16d   : > { %s482_s4 = scalar_lea.sflag [#allocation4], %s481_s11 }
 0x16e   : > { %p645_p1 = pnand %p1174_p0, %p973_p11 }
 0x170   : > { %p646_p3 = pneg %p645_p1 }
 0x172   : > { %851 = dma.done.wait (%p646_p3), %s482_s4, 512  }
 0x173   : > { %853 = vsyncadd (%p646_p3), %s482_s4, 4294966784  ;;  %s22_s17 = sadd.s32 1, %s876_s17   ;;  %s1175_s9 = sld [smem:[#allocation12_spill]] }
 0x174   : > { %p19_p2 = scmp.ge.s32.totalorder %s22_s17, 4   ;;  %s1176_s14 = sld [smem:[#allocation15_spill]] }
 0x175   : > { %s1177_s15 = sld [smem:[#allocation13_spill]]  ;;  %s1179_s12 = smov %s860_s13 }
 0x176   : > { %s1178_s16 = sld [smem:[#allocation14_spill]]  ;;  %21 = sbr.rel (!%p19_p2) target bundleno = 10 (0xa), region = 102 }
 0x179   : > { %s1180_s13 = smov %s1175_s9 }
 0x17b   :  { %487 = vsyncpa [#allocation3], 1 }
 0x17c   :  { %489 = vsyncpa [#allocation3 + $0x1], 1 }
 0x17d   :  { %490 = vsyncpa [#allocation6], 1 }
 0x17e   :  { %492 = vsyncpa [#allocation6 + $0x1], 1 }
 0x17f   :  { %493 = vsyncpa [#allocation4], 1 }
 0x180   :  { %495 = vsyncpa [#allocation4 + $0x1], 1 }

</bundles_post_ra>
